<compile_context>
chip_gen: v5e
topology: v5e:2x2
jax: 0.10.0
libtpu: 0.0.40
codegen_flags: <defaults>
</compile_context>

<pallas_src>
import functools

import jax
import jax.numpy as jnp
from jax.experimental import pallas as pl
from jax.experimental.pallas import tpu as pltpu


def _softplus(x):
    # Numerically stable softplus, matches F.softplus(beta=1).
    return jnp.maximum(x, 0.0) + jnp.log1p(jnp.exp(-jnp.abs(x)))


def encoder_kernel(x_ref, w1_ref, b1_ref, wh_ref, bh_ref, out_ref):
    # Cast x to bf16 in VMEM (no extra HBM pass in the wrapper).
    x = x_ref[...].astype(w1_ref.dtype)
    # fc1 (bf16 MXU operands, f32 accumulation) + f32 bias + f32 softplus
    h = jnp.dot(x, w1_ref[...], preferred_element_type=jnp.float32) + b1_ref[...]
    h = _softplus(h)
    # Fused, lane-dense mu||logvar head: one MXU push, one unmasked
    # (TM, N_pad) f32 store.  Padded hidden columns hit zero weight rows, so
    # their softplus(0) values contribute nothing.
    out = jnp.dot(h.astype(wh_ref.dtype), wh_ref[...],
                  preferred_element_type=jnp.float32) + bh_ref[...]
    out_ref[...] = out.astype(out_ref.dtype)


def _round_up(x, m):
    return ((x + m - 1) // m) * m


def _cdiv(a, b):
    return -(-a // b)


@functools.partial(jax.jit, static_argnames=("max_tile",))
def encoder_forward(x, params, max_tile=1024):
    """x: (B, input_dim) f32.  params: dict of pre-transposed weights/biases.

    Returns (z_mu, z_logvar), each (B, z_dim) f32.
    """
    B, input_dim = x.shape
    hidden_dim = params["w1"].shape[1]
    z_dim = params["wmu"].shape[1]

    # --- pad feature dims to full 128-lane vregs ------------------------------
    H_pad = _round_up(hidden_dim, 128)
    N = 2 * z_dim
    N_pad = _round_up(N, 128)

    compute_dtype = jnp.bfloat16
    w1 = jnp.pad(params["w1"],
                 ((0, 0), (0, H_pad - hidden_dim))).astype(compute_dtype)
    b1 = jnp.pad(params["b1"],
                 ((0, 0), (0, H_pad - hidden_dim))).astype(jnp.float32)
    w_heads = jnp.concatenate([params["wmu"], params["wlv"]], axis=1)
    w_heads = jnp.pad(w_heads,
                      ((0, H_pad - hidden_dim), (0, N_pad - N))).astype(compute_dtype)
    b_heads = jnp.concatenate([params["bmu"], params["blv"]], axis=1)
    b_heads = jnp.pad(b_heads, ((0, 0), (0, N_pad - N))).astype(jnp.float32)

    # --- batch tiling (no batch padding; Pallas handles the ragged last tile) -
    B8 = _round_up(B, 8)
    TM = min(max_tile, B8)
    if TM == B8 and B8 >= 16:
        # Guarantee >= 2 grid tiles so the "parallel" axis can use both
        # TensorCores on v7x (no-op on single-core v5e/v6e).
        TM = _round_up(_cdiv(B8, 2), 8)
    num_tiles = _cdiv(B, TM)

    cost = pl.CostEstimate(
        flops=2 * B * (input_dim * H_pad + H_pad * N_pad),
        transcendentals=2 * B * H_pad,
        bytes_accessed=(B * input_dim * 4            # x (f32 in)
                        + B * N_pad * 4              # fused output slab
                        + input_dim * H_pad * 2      # W1 (bf16)
                        + H_pad * N_pad * 2          # W_heads (bf16)
                        + (H_pad + N_pad) * 4),      # biases (f32)
    )

    out = pl.pallas_call(
        encoder_kernel,
        out_shape=jax.ShapeDtypeStruct((B, N_pad), jnp.float32),
        grid=(num_tiles,),
        in_specs=[
            pl.BlockSpec((TM, input_dim), lambda i: (i, 0)),      # x tile (f32)
            pl.BlockSpec((input_dim, H_pad), lambda i: (0, 0)),   # W1 (resident)
            pl.BlockSpec((1, H_pad), lambda i: (0, 0)),           # b1 (resident)
            pl.BlockSpec((H_pad, N_pad), lambda i: (0, 0)),       # W_heads
            pl.BlockSpec((1, N_pad), lambda i: (0, 0)),           # b_heads
        ],
        out_specs=pl.BlockSpec((TM, N_pad), lambda i: (i, 0)),
        compiler_params=pltpu.CompilerParams(
            dimension_semantics=("parallel",),
            vmem_limit_bytes=32 << 20,
        ),
        cost_estimate=cost,
    )(x, w1, b1, w_heads, b_heads)

    z_mu = out[:, :z_dim]
    z_logvar = out[:, z_dim:2 * z_dim]
    return z_mu, z_logvar


def init_params(key, input_dim, z_dim, hidden_dim):
    """Deterministic init mimicking nn.Linear (uniform +-1/sqrt(fan_in)).
    Weights stored pre-transposed: (in_features, out_features)."""
    ks = jax.random.split(key, 6)

    def lin(kw, kb, fan_in, fan_out):
        bound = 1.0 / jnp.sqrt(fan_in)
        w = jax.random.uniform(kw, (fan_in, fan_out), jnp.float32, -bound, bound)
        b = jax.random.uniform(kb, (1, fan_out), jnp.float32, -bound, bound)
        return w, b

    w1, b1 = lin(ks[0], ks[1], input_dim, hidden_dim)
    wmu, bmu = lin(ks[2], ks[3], hidden_dim, z_dim)
    wlv, blv = lin(ks[4], ks[5], hidden_dim, z_dim)
    return {"w1": w1, "b1": b1, "wmu": wmu, "bmu": bmu, "wlv": wlv, "blv": blv}


if __name__ == "__main__":
    key = jax.random.PRNGKey(0)
    kx, kp = jax.random.split(key)

    batch, input_dim, hidden_dim, z_dim = 8, 32, 64, 16
    x = jax.random.normal(kx, (batch, input_dim), jnp.float32)
    params = init_params(kp, input_dim, z_dim, hidden_dim)

    mu, logvar = encoder_forward(x, params)
    jax.block_until_ready((mu, logvar))

    assert mu.shape == (batch, z_dim) and logvar.shape == (batch, z_dim)

    # Reference check: pure-JAX forward with the same bf16-rounded operands
    # (kernel uses bf16 MXU inputs with f32 accumulation).
    def bf(a):
        return a.astype(jnp.bfloat16).astype(jnp.float32)

    xb = bf(x)
    h_ref = jax.nn.softplus(xb @ bf(params["w1"]) + params["b1"])
    hb = bf(h_ref)
    mu_ref = hb @ bf(params["wmu"]) + params["bmu"]
    lv_ref = hb @ bf(params["wlv"]) + params["blv"]

    assert jnp.allclose(mu, mu_ref, atol=1e-3, rtol=1e-3), "mu mismatch"
    assert jnp.allclose(logvar, lv_ref, atol=1e-3, rtol=1e-3), "logvar mismatch"

    print("KERNEL_OK")
</pallas_src>

<mosaic_0001>
module attributes {stable_mosaic.version = 11 : i64} {
  func.func @encoder_kernel(%arg0: i32, %arg1: memref<8x32xf32, #tpu.memory_space<vmem>>, %arg2: memref<32x128xbf16, #tpu.memory_space<vmem>>, %arg3: memref<1x128xf32, #tpu.memory_space<vmem>>, %arg4: memref<128x128xbf16, #tpu.memory_space<vmem>>, %arg5: memref<1x128xf32, #tpu.memory_space<vmem>>, %arg6: memref<8x128xf32, #tpu.memory_space<vmem>>) attributes {dimension_semantics = [#tpu.dimension_semantics<parallel>], iteration_bounds = array<i64: 1>, scalar_prefetch = 0 : i64, scratch_operands = 0 : i64, tpu.core_type = #tpu.core_type<tc>, window_params = [{transform_indices = @transform_0, window_bounds = array<i64: 8, 32>}, {pipeline_mode = #tpu.pipeline_mode<synchronous>, transform_indices = @transform_1, window_bounds = array<i64: 32, 128>}, {pipeline_mode = #tpu.pipeline_mode<synchronous>, transform_indices = @transform_2, window_bounds = array<i64: 1, 128>}, {pipeline_mode = #tpu.pipeline_mode<synchronous>, transform_indices = @transform_3, window_bounds = array<i64: 128, 128>}, {pipeline_mode = #tpu.pipeline_mode<synchronous>, transform_indices = @transform_4, window_bounds = array<i64: 1, 128>}, {transform_indices = @transform_5, window_bounds = array<i64: 8, 128>}]} {
    %c0 = arith.constant 0 : index
    %c0_0 = arith.constant 0 : index
    %0 = vector.load %arg1[%c0, %c0_0] : memref<8x32xf32, #tpu.memory_space<vmem>>, vector<8x32xf32>
    %1 = arith.truncf %0 : vector<8x32xf32> to vector<8x32xbf16>
    %c0_1 = arith.constant 0 : index
    %c0_2 = arith.constant 0 : index
    %2 = vector.load %arg2[%c0_1, %c0_2] : memref<32x128xbf16, #tpu.memory_space<vmem>>, vector<32x128xbf16>
    %cst = arith.constant dense<0.000000e+00> : vector<8x128xf32>
    %3 = tpu.matmul %1, %2, %cst {dimension_numbers = #tpu.dot_dimension_numbers<[1], [0], [0], [1], [0, 0, 1, 1], [], []>} : vector<8x32xbf16>, vector<32x128xbf16>, vector<8x128xf32> -> vector<8x128xf32>
    %c0_3 = arith.constant 0 : index
    %c0_4 = arith.constant 0 : index
    %4 = vector.load %arg3[%c0_3, %c0_4] : memref<1x128xf32, #tpu.memory_space<vmem>>, vector<1x128xf32>
    %5 = vector.broadcast %4 : vector<1x128xf32> to vector<8x128xf32>
    %6 = arith.addf %3, %5 : vector<8x128xf32>
    %cst_5 = arith.constant 0.000000e+00 : f32
    %7 = vector.broadcast %cst_5 : f32 to vector<8x128xf32>
    %8 = arith.maximumf %6, %7 : vector<8x128xf32>
    %9 = math.absf %6 : vector<8x128xf32>
    %cst_6 = arith.constant 0.000000e+00 : f32
    %10 = vector.broadcast %cst_6 : f32 to vector<8x128xf32>
    %11 = arith.subf %10, %9 : vector<8x128xf32>
    %12 = math.exp %11 : vector<8x128xf32>
    %13 = math.log1p %12 : vector<8x128xf32>
    %14 = arith.addf %8, %13 : vector<8x128xf32>
    %15 = arith.truncf %14 : vector<8x128xf32> to vector<8x128xbf16>
    %c0_7 = arith.constant 0 : index
    %c0_8 = arith.constant 0 : index
    %16 = vector.load %arg4[%c0_7, %c0_8] : memref<128x128xbf16, #tpu.memory_space<vmem>>, vector<128x128xbf16>
    %cst_9 = arith.constant dense<0.000000e+00> : vector<8x128xf32>
    %17 = tpu.matmul %15, %16, %cst_9 {dimension_numbers = #tpu.dot_dimension_numbers<[1], [0], [0], [1], [0, 0, 1, 1], [], []>} : vector<8x128xbf16>, vector<128x128xbf16>, vector<8x128xf32> -> vector<8x128xf32>
    %c0_10 = arith.constant 0 : index
    %c0_11 = arith.constant 0 : index
    %18 = vector.load %arg5[%c0_10, %c0_11] : memref<1x128xf32, #tpu.memory_space<vmem>>, vector<1x128xf32>
    %19 = vector.broadcast %18 : vector<1x128xf32> to vector<8x128xf32>
    %20 = arith.addf %17, %19 : vector<8x128xf32>
    %c0_12 = arith.constant 0 : index
    %c0_13 = arith.constant 0 : index
    %21 = vector.load %arg6[%c0_12, %c0_13] : memref<8x128xf32, #tpu.memory_space<vmem>>, vector<8x128xf32>
    tpu.vector_store %arg6[%c0_12, %c0_13], %20 {strides = array<i32>} : memref<8x128xf32, #tpu.memory_space<vmem>>, vector<8x128xf32>,
    return
  }
  func.func @transform_0(%arg0: i32) -> (i32, i32) {
    %c0_i32 = arith.constant 0 : i32
    %c0_i32_0 = arith.constant 0 : i32
    return %arg0, %c0_i32 : i32, i32
  }
  func.func @transform_1(%arg0: i32) -> (i32, i32) {
    %c0_i32 = arith.constant 0 : i32
    %c0_i32_0 = arith.constant 0 : i32
    %c0_i32_1 = arith.constant 0 : i32
    return %c0_i32, %c0_i32_0 : i32, i32
  }
  func.func @transform_2(%arg0: i32) -> (i32, i32) {
    %c0_i32 = arith.constant 0 : i32
    %c0_i32_0 = arith.constant 0 : i32
    %c0_i32_1 = arith.constant 0 : i32
    return %c0_i32, %c0_i32_0 : i32, i32
  }
  func.func @transform_3(%arg0: i32) -> (i32, i32) {
    %c0_i32 = arith.constant 0 : i32
    %c0_i32_0 = arith.constant 0 : i32
    %c0_i32_1 = arith.constant 0 : i32
    return %c0_i32, %c0_i32_0 : i32, i32
  }
  func.func @transform_4(%arg0: i32) -> (i32, i32) {
    %c0_i32 = arith.constant 0 : i32
    %c0_i32_0 = arith.constant 0 : i32
    %c0_i32_1 = arith.constant 0 : i32
    return %c0_i32, %c0_i32_0 : i32, i32
  }
  func.func @transform_5(%arg0: i32) -> (i32, i32) {
    %c0_i32 = arith.constant 0 : i32
    %c0_i32_0 = arith.constant 0 : i32
    return %arg0, %c0_i32 : i32, i32
  }
}

</mosaic_0001>

<bundles_post_ra>
// kernel: encoder_forward.1
= control target key start
LH: loop header
LB: loop body
LE: loop exit
PB: predicated region body
PF: predicated region fallthrough
CT: control target
= control target key end

     0   :  { %vm43_vm0 = vcmask 261120   ;;  %s291_s1 = inlined_call_operand.vmem [shape: bf16[32,128], index: 1, kind: input, shape index: {}]   ;;  %s292_s0 = inlined_call_operand.vmem [shape: f32[8,32], index: 0, kind: input, shape index: {}]   ;;  %s293_s2 = inlined_call_operand.vmem [shape: f32[1,128], index: 2, kind: input, shape index: {}]   ;;  %s294_s4 = inlined_call_operand.vmem [shape: f32[1,128], index: 4, kind: input, shape index: {}]   ;;  %s295_s3 = inlined_call_operand.vmem [shape: bf16[128,128], index: 3, kind: input, shape index: {}]   ;;  %s296_s5 = inlined_call_operand.vmem [shape: f32[8,128], index: 5, kind: output, shape index: {}]  }
   0x1   :  { %v204_v0 = vld [vmem:[%s291_s1 + $0x8] sm:$0xff]  ;;  %v203_v1 = vld [vmem:[%s291_s1] sm:$0xff]  ;;  %v212_v4 = vld [vmem:[%s295_s3 + $0x38] sm:$0xff] }
   0x2   :  { %53 = vmatpush.bf16.msra.mxu0 %v204_v0  ;;  %v21_v2 = vld [vmem:[%s292_s0] sm:$0xff]  ;;  %144 = vmatpush.bf16.msra.mxu1 %v212_v4  ;;  %v211_v5 = vld [vmem:[%s295_s3 + $0x30] sm:$0xff]  ;;  %v210_v6 = vld [vmem:[%s295_s3 + $0x28] sm:$0xff] }
   0x3   :  { %v22_v3 = vpack.c.bf16 %v21_v2, %v21_v2  ;;  %v209_v7 = vld [vmem:[%s295_s3 + $0x20] sm:$0xff]  ;;  %v208_v8 = vld [vmem:[%s295_s3 + $0x18] sm:$0xff]  ;;  %v207_v9 = vld [vmem:[%s295_s3 + $0x10] sm:$0xff] }
   0x4   :  { %v206_v10 = vld [vmem:[%s295_s3 + $0x8] sm:$0xff]  ;;  %v205_v11 = vld [vmem:[%s295_s3] sm:$0xff] }
   0x5   :  { %v213_v12 = vld [vmem:[%s293_s2] ss:$0 sm:$0xff] }
   0x6   :  { %54 = vmatpush.bf16.msra.mxu0 %v203_v1  ;;  %145 = vmatpush.bf16.msra.mxu1 %v211_v5  ;;  %v214_v31 = vld [vmem:[%s294_s4] ss:$0 sm:$0xff] }
   0x9   :  { %170 = vmatmul.msk.bf16.vlgmr.msra.gmra.mxu0 %vm43_vm0, %v22_v3 }
   0xa   :  { %146 = vmatpush.bf16.msra.mxu1 %v210_v6 }
   0xe   :  { %147 = vmatpush.bf16.msra.mxu1 %v209_v7 }
  0x12   :  { %148 = vmatpush.bf16.msra.mxu1 %v208_v8 }
  0x16   :  { %149 = vmatpush.bf16.msra.mxu1 %v207_v9 }
  0x1a   :  { %150 = vmatpush.bf16.msra.mxu1 %v206_v10 }
  0x1e   :  { %151 = vmatpush.bf16.msra.mxu1 %v205_v11 }
  0x86   :  { %v56_v13 = vpop.f32.mrf.mxu0 }
  0x87   :  { %v57_v14 = vadd.f32 %v213_v12, %v56_v13 }
  0x89   :  { %v61_v15 = vand.u32 2147483647, %v57_v14  ;;  %v60_v27 = vmax.f32 %v57_v14, 0.0 }
  0x8b   :  { %v62_v16 = vsub.f32 0.0, %v61_v15 }
  0x8d   :  { %v63_v17 = vmul.f32 1.442695, %v62_v16 }
  0x8e   :  { %v58_v18 = vpop.f32.mrf.mxu0 }
  0x8f   :  { %215 = vpow2.f32 %v63_v17 }
  0x95   :  { %v216_v19 = vpop.eup %215 }
  0x96   :  { %v65_v20 = vadd.f32 1.0, %v216_v19  ;;  %v68_v21 = vmul.f32 -0.5, %v216_v19  ;;  %v71_v23 = vand.u32 2147483647, %v216_v19 }
  0x98   :  { %217 = vlog2.f32 %v65_v20  ;;  %v69_v22 = vadd.f32 1.0, %v68_v21  ;;  %vm72_vm1 = vcmp.lt.f32.partialorder %v71_v23, 0.0004427343 }
  0x9a   :  { %v70_v26 = vmul.f32 %v216_v19, %v69_v22 }
  0x9e   :  { %v218_v24 = vpop.eup %217 }
  0x9f   :  { %v67_v25 = vmul.f32 0.6931472, %v218_v24 }
  0xa1   :  { %v73_v28 = vsel %vm72_vm1, %v70_v26, %v67_v25 }
  0xa2   :  { %v74_v29 = vadd.f32 %v73_v28, %v60_v27 }
  0xa4   :  { %v75_v30 = vpack.c.bf16 %v74_v29, %v74_v29 }
  0xa6   :  { %152 = vmatmul.bf16.vlgmr.msra.gmra.mxu1 %v75_v30 }
 0x123   :  { %v153_v32 = vpop.f32.mrf.mxu1 }
 0x124   :  { %v154_v33 = vadd.f32 %v214_v31, %v153_v32 }
 0x126   :  { %157 = vst [vmem:[%s296_s5] sm:$0xff] %v154_v33 }
 0x12b   :  { %v155_v34 = vpop.f32.mrf.mxu1 }

</bundles_post_ra>
